<compile_context>
chip_gen: v6e
topology: v6e:2x2x1
jax: 0.10.0
libtpu: 0.0.40
codegen_flags: <defaults>
</compile_context>

<pallas_src>
import functools

import jax
import jax.numpy as jnp
from jax import lax
from jax.experimental import pallas as pl
from jax.experimental.pallas import tpu as pltpu

_MASK_FILL = -10000.0  # Megatron attention_mask_func fill value


# --------------------------------------------------------------------------- #
# Kernels
# --------------------------------------------------------------------------- #
def _softmax_tail(x, out_dtype, approx):
    x = x - jnp.max(x, axis=-1, keepdims=True)
    e = jnp.exp(x)
    denom = jnp.sum(e, axis=-1, keepdims=True)
    return (e * pl.reciprocal(denom, approx=approx)).astype(out_dtype)


def _softmax_kernel(x_ref, o_ref, *, scale, compute_dtype, approx):
    """No-mask variant: scale -> softmax(last axis)."""
    x = x_ref[...].astype(compute_dtype)
    if scale is not None:
        x = x * jnp.asarray(scale, dtype=compute_dtype)
    o_ref[...] = _softmax_tail(x, o_ref.dtype, approx)


def _scale_mask_softmax_kernel(x_ref, m_ref, o_ref, *, scale, compute_dtype, approx):
    """Masked variant: scale -> masked_fill(mask, -10000) -> softmax(last axis).

    x_ref: (1, TH, TQ, SK); m_ref: (1, 1, TQ, SK) or (1, TH, TQ, SK), bool/int.
    The head-dim broadcast of a shared mask happens in-register.
    """
    x = x_ref[...].astype(compute_dtype)
    if scale is not None:
        x = x * jnp.asarray(scale, dtype=compute_dtype)
    m = m_ref[...]
    if m.dtype != jnp.bool_:
        m = m != 0
    x = jnp.where(m, jnp.asarray(_MASK_FILL, dtype=compute_dtype), x)
    o_ref[...] = _softmax_tail(x, o_ref.dtype, approx)


def _scale_causal_softmax_kernel(x_ref, o_ref, *, scale, compute_dtype, approx,
                                 tq, sq, sk):
    """Causal (upper-triangular) variant: mask generated in-kernel, no HBM mask."""
    x = x_ref[...].astype(compute_dtype)
    if scale is not None:
        x = x * jnp.asarray(scale, dtype=compute_dtype)
    q0 = pl.program_id(1) * tq
    rows = lax.broadcasted_iota(jnp.int32, (tq, sk), 0) + q0
    cols = lax.broadcasted_iota(jnp.int32, (tq, sk), 1)
    masked = cols > rows + (sk - sq)          # True = masked out
    x = jnp.where(masked[None, None, :, :],
                  jnp.asarray(_MASK_FILL, dtype=compute_dtype), x)
    o_ref[...] = _softmax_tail(x, o_ref.dtype, approx)


# --------------------------------------------------------------------------- #
# Tiling helpers
# --------------------------------------------------------------------------- #
def _largest_divisor_leq(n, cap):
    cap = max(1, min(int(n), int(cap)))
    for d in range(cap, 0, -1):
        if n % d == 0:
            return d
    return 1


def _sublane_packing(*dtypes):
    """Rows per packed sublane group for the narrowest streamed dtype.

    fp32 -> 8, bf16/fp16 -> 16, int8/bool -> 32.
    """
    p = 8
    for dt in dtypes:
        itemsize = max(1, jnp.dtype(dt).itemsize)
        p = max(p, 8 * max(1, 4 // itemsize))
    return p


def _choose_row_tile(sq, rows_target, packing):
    """q-row tile: multiple of the sublane packing (preferred), multiple of 8
    (hard TPU block constraint), or the full extent (always legal)."""
    cap = max(1, min(int(sq), int(rows_target)))
    for p in (packing, 8):
        t = (cap // p) * p
        if t > 0:
            return t
    return int(sq)


def _vmem_capacity_bytes():
    try:
        return int(pltpu.get_tpu_info().vmem_capacity_bytes)
    except Exception:
        return 64 * 1024 * 1024  # conservative (v7x per-core VMEM)


# --------------------------------------------------------------------------- #
# Wrapper
# --------------------------------------------------------------------------- #
def fused_scale_mask_softmax(x, mask=None, *, scale=None, softmax_in_fp32=True,
                             causal=False, approx_reciprocal=True):
    """Forward pass of FusedScaleMaskSoftmax.

    x:      [B, NP, SQ, SK] attention scores (fp32 / bf16 / fp16)
    mask:   None, or boolean-ish [B, 1, SQ, SK] / [B, NP, SQ, SK]; True = masked out
    causal: True -> in-kernel upper-triangular mask (ScaledUpperTriangMaskedSoftmax
            path); mutually exclusive with an explicit mask.
    """
    assert x.ndim == 4, "input must be 4-D (b, np, sq, sk)"
    b, np_, sq, sk = x.shape
    x_float16 = x.dtype in (jnp.float16, jnp.bfloat16)
    assert scale is None or softmax_in_fp32, "softmax should be in fp32 when scaled"
    assert not (causal and mask is not None), "use either an explicit mask or causal=True"

    if mask is not None:
        mask = jnp.asarray(mask)
        assert mask.ndim == 4, "mask must be 4-D (b, 1 or np, sq, sk)"
        mhead = mask.shape[1]
        assert mask.shape[0] == b and mhead in (1, np_) and mask.shape[2:] == (sq, sk)

    # Compute dtype: fp32 when input is fp32 or softmax_in_fp32.  fp16 math has
    # no native TPU VPU/EUP support, so fp16 always computes in fp32.
    # TODO(synk): bit-exact fp16-compute parity with the CUDA path is not reproduced.
    if (not x_float16) or softmax_in_fp32 or x.dtype == jnp.float16:
        compute_dtype = jnp.float32
    else:
        compute_dtype = x.dtype
    out_dtype = x.dtype  # module always returns the input dtype

    # ---- generation-aware block sizing (full SK per block; SK is the reduction) ----
    vmem_cap = _vmem_capacity_bytes()
    if vmem_cap >= 96 * 1024 * 1024:           # v5e / v6e: 128 MiB VMEM
        target_block_bytes = 4 * 1024 * 1024
        vmem_limit = 64 * 1024 * 1024
    else:                                       # v7x: 64 MiB VMEM per core
        target_block_bytes = 2 * 1024 * 1024
        vmem_limit = 36 * 1024 * 1024
    vmem_limit = min(vmem_limit, vmem_cap)

    streamed_dtypes = (x.dtype,) if mask is None else (x.dtype, mask.dtype)
    packing = _sublane_packing(*streamed_dtypes)

    # Size using 4 B/elem so the fp32 intermediates of one block stay near the
    # target; double-buffered in/out/mask + fp32 temps fit the vmem limit.
    rows_target = max(1, target_block_bytes // (sk * 4))
    if rows_target >= sq:
        tq = sq
        th = _largest_divisor_leq(np_, max(1, rows_target // max(sq, 1)))
    else:
        th = 1
        tq = _choose_row_tile(sq, rows_target, packing)

    # Grid: head axis innermost so a shared [B,1,SQ,SK] mask block keeps the same
    # block index across consecutive steps (Pallas skips the redundant re-DMA).
    grid = (b, pl.cdiv(sq, tq), pl.cdiv(np_, th))

    x_spec = pl.BlockSpec((1, th, tq, sk), lambda bi, qi, hi: (bi, hi, qi, 0))
    o_spec = pl.BlockSpec((1, th, tq, sk), lambda bi, qi, hi: (bi, hi, qi, 0))

    compiler_params = pltpu.CompilerParams(
        dimension_semantics=("parallel", "parallel", "arbitrary"),
        vmem_limit_bytes=vmem_limit,
    )

    # TODO(synk): for sk < 128 the stores are lane-masked (vst.msk); a lane-dense
    # repack of the output slab would help short-key shapes.

    out_shape = jax.ShapeDtypeStruct((b, np_, sq, sk), out_dtype)

    if causal:
        kernel = functools.partial(
            _scale_causal_softmax_kernel, scale=scale, compute_dtype=compute_dtype,
            approx=approx_reciprocal, tq=tq, sq=sq, sk=sk)
        return pl.pallas_call(
            kernel, out_shape=out_shape, grid=grid,
            in_specs=[x_spec], out_specs=o_spec,
            compiler_params=compiler_params,
        )(x)

    if mask is None:
        kernel = functools.partial(
            _softmax_kernel, scale=scale, compute_dtype=compute_dtype,
            approx=approx_reciprocal)
        return pl.pallas_call(
            kernel, out_shape=out_shape, grid=grid,
            in_specs=[x_spec], out_specs=o_spec,
            compiler_params=compiler_params,
        )(x)

    # ---- masked path: bool mask streamed as-is (1 B/elem), no wrapper pass ----
    if mhead == 1:
        # one mask tile shared by every head block: head grid index is dropped,
        # and with heads innermost the block index is constant across heads.
        m_spec = pl.BlockSpec((1, 1, tq, sk), lambda bi, qi, hi: (bi, 0, qi, 0))
    else:
        m_spec = pl.BlockSpec((1, th, tq, sk), lambda bi, qi, hi: (bi, hi, qi, 0))

    kernel = functools.partial(
        _scale_mask_softmax_kernel, scale=scale, compute_dtype=compute_dtype,
        approx=approx_reciprocal)
    return pl.pallas_call(
        kernel, out_shape=out_shape, grid=grid,
        in_specs=[x_spec, m_spec], out_specs=o_spec,
        compiler_params=compiler_params,
    )(x, mask)


# --------------------------------------------------------------------------- #
# Pure-JAX reference (mirrors forward_torch_softmax)
# --------------------------------------------------------------------------- #
def _reference(x, mask, scale):
    xf = x.astype(jnp.float32)
    if scale is not None:
        xf = xf * scale
    if mask is not None:
        xf = jnp.where(jnp.broadcast_to(mask, xf.shape), _MASK_FILL, xf)
    y = jax.nn.softmax(xf, axis=-1)
    return y.astype(x.dtype)


# TODO(synk): backward pass and the is_kernel_available / get_batch_per_block
# CUDA-dispatch heuristics are not translated; only the forward math is implemented.

if __name__ == "__main__":
    key = jax.random.PRNGKey(0)
    B, NP, SQ, SK = 2, 4, 8, 128  # small attention-score shape: [b, heads, sq, sk]
    scale = 0.125                 # e.g. 1/sqrt(head_dim)

    kx, _ = jax.random.split(key)
    x = jax.random.normal(kx, (B, NP, SQ, SK), dtype=jnp.float32).astype(jnp.bfloat16)

    # deterministic causal-style mask, shape [B, 1, SQ, SK]; True = mask out
    q_ids = jnp.arange(SQ)[:, None]
    k_ids = jnp.arange(SK)[None, :]
    causal_bool = k_ids > (q_ids + (SK - SQ))
    mask = jnp.broadcast_to(causal_bool[None, None], (B, 1, SQ, SK))

    # masked path (bool mask passed straight into the kernel, shared across heads)
    y = fused_scale_mask_softmax(x, mask, scale=scale, softmax_in_fp32=True)
    y = jax.block_until_ready(y)
    y_ref = _reference(x, mask, scale)
    assert y.shape == (B, NP, SQ, SK)
    assert y.dtype == x.dtype
    err = jnp.max(jnp.abs(y.astype(jnp.float32) - y_ref.astype(jnp.float32)))
    assert float(err) < 1e-2, f"masked path: max abs error too large: {err}"

    # unmasked path (separate kernel, no mask stream at all)
    y2 = fused_scale_mask_softmax(x, None, scale=scale, softmax_in_fp32=True)
    y2 = jax.block_until_ready(y2)
    y2_ref = _reference(x, None, scale)
    err2 = jnp.max(jnp.abs(y2.astype(jnp.float32) - y2_ref.astype(jnp.float32)))
    assert float(err2) < 1e-2, f"unmasked path: max abs error too large: {err2}"

    # causal path (upper-triangular mask generated in-kernel, zero mask HBM bytes)
    y3 = fused_scale_mask_softmax(x, None, scale=scale, softmax_in_fp32=True,
                                  causal=True)
    y3 = jax.block_until_ready(y3)
    err3 = jnp.max(jnp.abs(y3.astype(jnp.float32) - y_ref.astype(jnp.float32)))
    assert float(err3) < 1e-2, f"causal path: max abs error too large: {err3}"

    print("KERNEL_OK")
</pallas_src>

<mosaic_0001>
module attributes {stable_mosaic.version = 11 : i64} {
  func.func @_scale_mask_softmax_kernel(%arg0: i32, %arg1: i32, %arg2: i32, %arg3: memref<1x4x8x128xbf16, #tpu.memory_space<vmem>>, %arg4: memref<1x1x8x128xi32, #tpu.memory_space<vmem>>, %arg5: memref<1x4x8x128xbf16, #tpu.memory_space<vmem>>) attributes {dimension_semantics = [#tpu.dimension_semantics<parallel>, #tpu.dimension_semantics<parallel>, #tpu.dimension_semantics<arbitrary>], iteration_bounds = array<i64: 2, 1, 1>, scalar_prefetch = 0 : i64, scratch_operands = 0 : i64, tpu.core_type = #tpu.core_type<tc>, window_params = [{transform_indices = @transform_0, window_bounds = array<i64: 1, 4, 8, 128>}, {transform_indices = @transform_1, window_bounds = array<i64: 1, 1, 8, 128>}, {transform_indices = @transform_2, window_bounds = array<i64: 1, 4, 8, 128>}]} {
    %c0 = arith.constant 0 : index
    %c0_0 = arith.constant 0 : index
    %c0_1 = arith.constant 0 : index
    %c0_2 = arith.constant 0 : index
    %0 = vector.load %arg3[%c0, %c0_0, %c0_1, %c0_2] : memref<1x4x8x128xbf16, #tpu.memory_space<vmem>>, vector<1x4x8x128xbf16>
    %1 = arith.extf %0 : vector<1x4x8x128xbf16> to vector<1x4x8x128xf32>
    %cst = arith.constant 1.250000e-01 : f32
    %2 = vector.broadcast %cst : f32 to vector<1x4x8x128xf32>
    %3 = arith.mulf %1, %2 : vector<1x4x8x128xf32>
    %c0_3 = arith.constant 0 : index
    %c0_4 = arith.constant 0 : index
    %c0_5 = arith.constant 0 : index
    %c0_6 = arith.constant 0 : index
    %4 = vector.load %arg4[%c0_3, %c0_4, %c0_5, %c0_6] : memref<1x1x8x128xi32, #tpu.memory_space<vmem>>, vector<1x1x8x128xi32>
    %cst_7 = arith.constant dense<0> : vector<1x1x8x128xi32>
    %5 = arith.cmpi ne, %4, %cst_7 : vector<1x1x8x128xi32>
    %cst_8 = arith.constant -1.000000e+04 : f32
    %6 = vector.shape_cast %5 : vector<1x1x8x128xi1> to vector<1x1x8x128xi1>
    %7 = vector.broadcast %6 : vector<1x1x8x128xi1> to vector<1x4x8x128xi1>
    %8 = vector.broadcast %cst_8 : f32 to vector<1x4x8x128xf32>
    %9 = arith.select %7, %8, %3 : vector<1x4x8x128xi1>, vector<1x4x8x128xf32>
    %cst_9 = arith.constant dense<0xFF800000> : vector<1x4x8xf32>
    %10 = vector.multi_reduction <maximumf>, %9, %cst_9 [3] : vector<1x4x8x128xf32> to vector<1x4x8xf32>
    %11 = vector.shape_cast %10 : vector<1x4x8xf32> to vector<1x4x8x1xf32>
    %12 = vector.broadcast %11 : vector<1x4x8x1xf32> to vector<1x4x8x128xf32>
    %13 = arith.subf %9, %12 : vector<1x4x8x128xf32>
    %14 = math.exp %13 : vector<1x4x8x128xf32>
    %cst_10 = arith.constant dense<0.000000e+00> : vector<1x4x8xf32>
    %15 = vector.multi_reduction <add>, %14, %cst_10 [3] : vector<1x4x8x128xf32> to vector<1x4x8xf32>
    %16 = vector.shape_cast %15 : vector<1x4x8xf32> to vector<1x4x8x1xf32>
    %17 = tpu.reciprocal %16 {approx = true} : vector<1x4x8x1xf32> -> vector<1x4x8x1xf32>
    %18 = vector.broadcast %17 : vector<1x4x8x1xf32> to vector<1x4x8x128xf32>
    %19 = arith.mulf %14, %18 : vector<1x4x8x128xf32>
    %20 = arith.truncf %19 : vector<1x4x8x128xf32> to vector<1x4x8x128xbf16>
    %c0_11 = arith.constant 0 : index
    %c0_12 = arith.constant 0 : index
    %c0_13 = arith.constant 0 : index
    %c0_14 = arith.constant 0 : index
    %21 = vector.load %arg5[%c0_11, %c0_12, %c0_13, %c0_14] : memref<1x4x8x128xbf16, #tpu.memory_space<vmem>>, vector<1x4x8x128xbf16>
    tpu.vector_store %arg5[%c0_11, %c0_12, %c0_13, %c0_14], %20 {strides = array<i32>} : memref<1x4x8x128xbf16, #tpu.memory_space<vmem>>, vector<1x4x8x128xbf16>,
    return
  }
  func.func @transform_0(%arg0: i32, %arg1: i32, %arg2: i32) -> (i32, i32, i32, i32) {
    %c0_i32 = arith.constant 0 : i32
    %c0_i32_0 = arith.constant 0 : i32
    return %arg0, %arg2, %arg1, %c0_i32 : i32, i32, i32, i32
  }
  func.func @transform_1(%arg0: i32, %arg1: i32, %arg2: i32) -> (i32, i32, i32, i32) {
    %c0_i32 = arith.constant 0 : i32
    %c0_i32_0 = arith.constant 0 : i32
    %c0_i32_1 = arith.constant 0 : i32
    return %arg0, %c0_i32, %arg1, %c0_i32_0 : i32, i32, i32, i32
  }
  func.func @transform_2(%arg0: i32, %arg1: i32, %arg2: i32) -> (i32, i32, i32, i32) {
    %c0_i32 = arith.constant 0 : i32
    %c0_i32_0 = arith.constant 0 : i32
    return %arg0, %arg2, %arg1, %c0_i32 : i32, i32, i32, i32
  }
}

</mosaic_0001>

<bundles_post_ra>
// kernel: tpu_custom_call.1
= control target key start
LH: loop header
LB: loop body
LE: loop exit
PB: predicated region body
PF: predicated region fallthrough
CT: control target
= control target key end

     0   :  { %7 = vsyncpa [#allocation3], 0  ;;  %s816_s0 = inlined_call_operand.hbm [shape: bf16[2,4,8,128], index: 0, kind: input, shape index: {}]   ;;  %s817_s1 = inlined_call_operand.vmem [shape: s32[2,1,8,128], index: 1, kind: input, shape index: {}]   ;;  %s818_s2 = inlined_call_operand.hbm [shape: bf16[2,4,8,128], index: 2, kind: output, shape index: {}]  }
   0x1   :  { %9 = vsyncpa [#allocation3 + $0x1], 0 }
   0x2   :  { %10 = vsyncpa [#allocation4], 0 }
   0x3   :  { %12 = vsyncpa [#allocation4 + $0x1], 0  ;;  %s661_s9 = smov 0   ;;  %s663_s10 = smov 0  }
   0x4   :  { %s665_s11 = smov 0   ;;  %s667_s12 = smov 0  }
   0x5   :  { %s669_s13 = smov 0   ;;  %s671_s14 = smov 0  }
   0x6 LB: > { %s410_s15 = sadd.s32 4294967295, %s638_s14   ;;  %s411_s16 = sadd.s32 4294967294, %s638_s14   ;;  %s638_s14 = sphi %s671_s14, %s18_s14   ;;  %s634_s13 = sphi %s669_s13, %s829_s13   ;;  %s630_s12 = sphi %s667_s12, %s828_s12   ;;  %s626_s11 = sphi %s665_s11, %s827_s11   ;;  %s622_s10 = sphi %s663_s10, %s826_s10   ;;  %s618_s9 = sphi %s661_s9, %s825_s9  }
   0x7   : > { %s37_s17 = sadd.s32 1, %s634_s13  ;;  %s48_s18 = sadd.s32 1, %s626_s11 }
   0x8   : > { %p39_p0 = scmp.ge.s32.totalorder %s37_s17, 2  ;;  %p55_p1 = scmp.ne.s32.totalorder %s626_s11, %s622_s10 }
   0x9   : > { %p56_p2 = scmp.eq.s32.totalorder %s638_s14, 0  ;;  %p61_p3 = scmp.ne.s32.totalorder %s622_s10, %s618_s9 }
   0xa   : > { %s831_s17 = smov (%p39_p0, %s37_s17), 0  ;;  %p62_p5 = scmp.eq.s32.totalorder %s410_s15, 0 }
   0xb   : > { %p702_p4 = por %p56_p2, %p55_p1  ;;  %s41_s20 = ssub.s32 %s634_s13, %s831_s17 }
   0xc   : > { %p117_p6 = scmp.eq.s32.totalorder %s410_s15, 1  ;;  %p46_p7 = scmp.eq.s32.totalorder %s41_s20, 0 }
   0xd   : > { %p708_p8 = por %p62_p5, %p61_p3  ;;  %p123_p10 = scmp.eq.s32.totalorder %s411_s16, 1 }
   0xe   : > { %p712_p9 = por %p117_p6, %p55_p1  ;;  %p460_p13 = scmp.lt.s32.totalorder %s638_s14, 2 }
   0xf   : > { %s717_s23 = scalar_select %p46_p7, %s626_s11, %s48_s18  }
  0x10   : > { %p719_p11 = por %p123_p10, %p61_p3  ;;  %s143_s25 = sand.u32 1, %s626_s11  }
  0x11   : > { %s414_s26 = sshll.u32 %s143_s25, 4  ;;  %s426_s27 = sshll.u32 %s634_s13, 8 }
  0x12   : > { %s156_s30 = scalar_lea.hbm %s816_s0, %s426_s27  ;;  %s147_s3 = scalar_lea.vmem [#allocation2], %s414_s26 }
  0x13   : > { %s157_s4 = sshll.u32 %s147_s3, 4  ;;  %p732_p0 = pnand %p460_p13, %p702_p4  ;;  %s158_s4 = int_to_ptr.vmem [resolvable:$true] %s157_s4 }
  0x14   : > { %p417_p1 = scmp.ge.s32.totalorder %s638_s14, 1  ;;  %s144_s6 = scalar_lea.sflag [#allocation3], %s143_s25 }
  0x15   : > { %p532_p2 = pneg %p732_p0  ;;  %s543_s7 = scalar_lea.vmem %s158_s4, 256 }
  0x16   : > { %p544_p3 = scmp.ne.s32.totalorder %s158_s4, %s543_s7  ;;  %s640_s8 = smov [#allocation2]  }
  0x17   : > { %s548_s15 = sshll.u32 %s640_s8, 4  ;;  %s549_s15 = int_to_ptr.vmem [resolvable:$false] %s548_s15 }
  0x18   : > { %p546_p5 = pnand %p544_p3, %p532_p2  ;;  %s550_s16 = scalar_lea.vmem %s549_s15, 512 }
  0x19   : > { %p551_p7 = scmp.lt.s32.totalorder %s158_s4, %s549_s15  ;;  %p552_p10 = scmp.lt.s32.totalorder %s550_s16, %s543_s7 }
  0x1a   : > { %p547_p6 = pneg %p546_p5 }
  0x1b   : > { %p553_p12 = por %p552_p10, %p551_p7 }
  0x1d   : > { %p554_p4 = pnand %p553_p12, %p547_p6 }
  0x1f   : > { %557 = shalt.err (!%p554_p4)
}
  0x20   : > { %s641_s18 = smov 64   ;;  %s642_s19 = smov 4  }
  0x21   : > { %455 = dma.hbm_to_vmem [thread:$0]  (!%p732_p0), %s156_s30, 256, %s158_s4, %s144_s6, %s641_s18, %s641_s18, %s642_s19  }
  0x22   : > { %p175_p13 = scmp.lt.s32.totalorder %s638_s14, 3 }
  0x24   : > { %p176_p2 = pnand %p417_p1, %p175_p13 }
  0x25   : > { %s745_s20 = sand.u32 (!%p176_p2), 1, %s622_s10  }
  0x26   : > { %179 = sbr.rel (%p176_p2) target bundleno = 387 (0x183), region = 28  ;;  %s418_s25 = sshll.u32 (!%p176_p2), %s745_s20, 4 }
  0x27   : > { %s182_s26 = scalar_lea.sflag (!%p176_p2), [#allocation3], %s745_s20  ;;  %s185_s27 = scalar_lea.vmem (!%p176_p2), [#allocation2], %s418_s25 }
  0x2b   : > { %609 = dma.done.wait (%p708_p8), %s182_s26, 256  }
  0x2c   : > { %611 = vsyncadd (%p708_p8), %s182_s26, 4294967040  ;;  %p214_p12 = scmp.lt.s32.totalorder %s630_s12, 1  ;;  %v429_v0 = vld [vmem:[%s185_s27] sm:$0xff]   ;;  %v446_v2 = vld [vmem:[%s185_s27 + $0x8] sm:$0xff]   ;;  %s427_s21 = sshll.u32 %s630_s12, 8 }
  0x2d   : > { %v430_v3 = vunpack.c.l.bf16 %v429_v0  ;;  %v434_v4 = vunpack.c.l.bf16 %v446_v2  ;;  %v431_v5 = vunpack.c.h.bf16 %v429_v0  ;;  %v435_v6 = vunpack.c.h.bf16 %v446_v2  ;;  %s212_s5 = scalar_lea.vmem [#allocation5], %s418_s25  ;;  %s766_s15 = scalar_lea.hbm %s818_s2, %s427_s21 }
  0x2e   : > { %s215_s28 = scalar_select %p214_p12, %s630_s12, 1 }
  0x2f   : > { %v230_v7 = vmul.f32 0.125, %v430_v3  ;;  %v232_v8 = vmul.f32 0.125, %v434_v4  ;;  %v231_v9 = vmul.f32 0.125, %v431_v5  ;;  %v233_v10 = vmul.f32 0.125, %v435_v6  ;;  %s303_s6 = sshll.u32 %s212_s5, 4  ;;  %s287_s12 = scalar_lea.sflag [#allocation4], %s745_s20  ;;  %s768_s6 = int_to_ptr.vmem [resolvable:$true] %s303_s6 }
  0x30   : > { %s420_s29 = sshll.u32 %s215_s28, 3  ;;  %s558_s16 = scalar_lea.vmem %s768_s6, 256 }
  0x31   : > { %s220_s4 = scalar_lea.vmem %s817_s1, %s420_s29  ;;  %p559_p8 = scmp.ne.s32.totalorder %s768_s6, %s558_s16 }
  0x32   : > { %v234_v1 = vld [vmem:[%s220_s4] sm:$0xff]  ;;  %s643_s18 = smov [#allocation5]  }
  0x33   : > { %vm235_vm0 = vcmp.ne.s32.totalorder %v234_v1, 0  ;;  %p560_p0 = pnand %p559_p8, %p712_p9  ;;  %s562_s19 = sshll.u32 %s643_s18, 4  ;;  %s563_s19 = int_to_ptr.vmem [resolvable:$false] %s562_s19 }
  0x34   : > { %v238_v11 = vsel %vm235_vm0, -10000.0, %v230_v7  ;;  %v240_v12 = vsel %vm235_vm0, -10000.0, %v232_v8  ;;  %v239_v13 = vsel %vm235_vm0, -10000.0, %v231_v9  ;;  %v241_v14 = vsel %vm235_vm0, -10000.0, %v233_v10  ;;  %s564_s25 = scalar_lea.vmem %s563_s19, 512  ;;  %p565_p3 = scmp.lt.s32.totalorder %s768_s6, %s563_s19 }
  0x35   : > { %242 = vmax.xlane.f32.xlu0 %v238_v11  ;;  %246 = vmax.xlane.f32.xlu1 %v240_v12  ;;  %p561_p1 = pneg %p560_p0  ;;  %p566_p5 = scmp.lt.s32.totalorder %s564_s25, %s558_s16 }
  0x37   : > { %p567_p6 = por %p566_p5, %p565_p3 }
  0x39   : > { %244 = vmax.xlane.f32.xlu0 %v239_v13  ;;  %248 = vmax.xlane.f32.xlu1 %v241_v14  ;;  %p568_p7 = pnand %p567_p6, %p561_p1 }
  0xbe   : > { %v243_v15 = vpop.xlane.xlu0 %242  ;;  %v247_v16 = vpop.xlane.xlu1 %246 }
  0xbf   : > { %v250_v17 = vsub.f32 %v238_v11, %v243_v15  ;;  %v252_v18 = vsub.f32 %v240_v12, %v247_v16 }
  0xc1   : > { %v254_v19 = vmul.f32 1.442695, %v250_v17  ;;  %v258_v20 = vmul.f32 1.442695, %v252_v18 }
  0xc2   : > { %v245_v21 = vpop.xlane.xlu0 %244  ;;  %v249_v22 = vpop.xlane.xlu1 %248 }
  0xc3   : > { %514 = vpow2.f32 %v254_v19  ;;  %v251_v23 = vsub.f32 %v239_v13, %v245_v21  ;;  %v253_v24 = vsub.f32 %v241_v14, %v249_v22 }
  0xc4   : > { %516 = vpow2.f32 %v258_v20 }
  0xc5   : > { %v256_v25 = vmul.f32 1.442695, %v251_v23  ;;  %v260_v26 = vmul.f32 1.442695, %v253_v24 }
  0xc7   : > { %518 = vpow2.f32 %v256_v25 }
  0xc8   : > { %520 = vpow2.f32 %v260_v26 }
  0xd0   : > { %v515_v27 = vpop.eup %514 }
  0xd1   : > { %262 = vadd.xlane.f32.xlu0 %v515_v27  ;;  %v517_v28 = vpop.eup %516 }
  0xd4   : > { %v519_v29 = vpop.eup %518 }
  0xd5   : > { %266 = vadd.xlane.f32.xlu0 %v517_v28  ;;  %264 = vadd.xlane.f32.xlu1 %v519_v29  ;;  %v521_v30 = vpop.eup %520 }
  0xd9   : > { %268 = vadd.xlane.f32.xlu1 %v521_v30 }
 0x15a   : > { %v263_v31 = vpop.xlane.xlu0 %262 }
 0x15b   : > { %522 = vrcp.f32 %v263_v31 }
 0x15e   : > { %v265_v32 = vpop.xlane.xlu1 %264  ;;  %v267_v33 = vpop.xlane.xlu0 %266 }
 0x15f   : > { %524 = vrcp.f32 %v265_v32 }
 0x160   : > { %526 = vrcp.f32 %v267_v33 }
 0x162   : > { %v269_v34 = vpop.xlane.xlu1 %268 }
 0x163   : > { %528 = vrcp.f32 %v269_v34 }
 0x168   : > { %v523_v35 = vpop.eup %522 }
 0x169   : > { %v274_v37 = vmul.f32 %v523_v35, %v515_v27 }
 0x16c   : > { %v525_v36 = vpop.eup %524 }
 0x16d   : > { %v275_v38 = vmul.f32 %v525_v36, %v519_v29  ;;  %v527_v39 = vpop.eup %526 }
 0x16e   : > { %v276_v42 = vmul.f32 %v527_v39, %v517_v28 }
 0x16f   : > { %v439_v40 = vpack.c.bf16 %v275_v38, %v274_v37 }
 0x170   : > { %v529_v41 = vpop.eup %528 }
 0x171   : > { %v277_v43 = vmul.f32 %v529_v41, %v521_v30  ;;  %440 = vst [vmem:[%s212_s5] sm:$0xff] %v439_v40  }
 0x173   : > { %v444_v44 = vpack.c.bf16 %v277_v43, %v276_v42 }
 0x175   : > { %447 = vst [vmem:[%s212_s5 + $0x8] sm:$0xff] %v444_v44  }
 0x176   : > { %571 = shalt.err (!%p568_p7)
}
 0x177   : > { %s572_s26 = scalar_lea.hbm %s766_s15, 256  ;;  %s576_s29 = scalar_lea.hbm %s818_s2, 512 }
 0x178   : > { %p573_p10 = scmp.ne.s32.totalorder %s766_s15, %s572_s26  ;;  %p577_p2 = scmp.lt.s32.totalorder %s766_s15, %s818_s2 }
 0x179   : > { %p578_p12 = scmp.lt.s32.totalorder %s576_s29, %s572_s26 }
 0x17a   : > { %p574_p4 = pnand %p573_p10, %p712_p9 }
 0x17b   : > { %p579_p8 = por %p578_p12, %p577_p2 }
 0x17c   : > { %p575_p13 = pneg %p574_p4 }
 0x17e   : > { %p580_p0 = pnand %p579_p8, %p575_p13 }
 0x180   : > { %583 = shalt.err (!%p580_p0)
}
 0x181   : > { %s644_s4 = smov 64   ;;  %s645_s21 = smov 4  }
 0x182   : > { %450 = dma.vmem_to_hbm [thread:$0]  (%p712_p9), %s768_s6, 256, %s766_s15, %s287_s12, %s644_s4, %s644_s4, %s645_s21  }
 0x183 PF: > { %s318_s5 = sand.u32 1, %s618_s9   ;;  %p824_p1 = scmp.ge.s32.totalorder %s638_s14, 2 }
 0x184   : > { %s319_s7 = scalar_lea.sflag [#allocation4], %s318_s5 }
 0x185   : > { %p457_p3 = pnand %p824_p1, %p719_p11 }
 0x187   : > { %p458_p5 = pneg %p457_p3 }
 0x189   : > { %613 = dma.done.wait (%p458_p5), %s319_s7, 256  }
 0x18a   : > { %615 = vsyncadd (%p458_p5), %s319_s7, 4294967040  ;;  %s18_s14 = sadd.s32 1, %s638_s14   ;;  %s825_s9 = smov %s622_s10 }
 0x18b   : > { %p15_p6 = scmp.ge.s32.totalorder %s18_s14, 4   ;;  %s826_s10 = smov %s626_s11 }
 0x18c   : > { %s827_s11 = smov %s717_s23  ;;  %s828_s12 = smov %s634_s13 }
 0x18d   : > { %s829_s13 = smov %s831_s17  ;;  %17 = sbr.rel (!%p15_p6) target bundleno = 6 (0x6), region = 76 }
 0x192   :  { %324 = vsyncpa [#allocation3], 1 }
 0x193   :  { %326 = vsyncpa [#allocation3 + $0x1], 1 }
 0x194   :  { %327 = vsyncpa [#allocation4], 1 }
 0x195   :  { %329 = vsyncpa [#allocation4 + $0x1], 1 }

</bundles_post_ra>
